<compile_context>
chip_gen: v6e
topology: v6e:2x2x1
jax: 0.10.0
libtpu: 0.0.40
codegen_flags: <defaults>
</compile_context>

<pallas_src>
import jax
import jax.numpy as jnp
from jax.experimental import pallas as pl
from jax.experimental.pallas import tpu as pltpu

LANE = 128


def _round_up(x, m):
    return (x + m - 1) // m * m


def _pick_batch_tile(B, requested):
    """Large tiles to amortize per-step overhead, but keep >=2 grid steps
    (v7x megacore) whenever the batch is big enough to split."""
    if B <= 32:
        # Tiny batch: one block equal to the full batch (always legal).
        return B
    if B <= 256:
        return _round_up(pl.cdiv(B, 2), 16)
    gran = 256
    return min(max(requested, gran), _round_up(pl.cdiv(B, 2), gran))


def generator_kernel(noise_ref,
                     w1_ref, b1_ref,
                     w2_ref, b2_ref,
                     w3_ref, b3_ref,
                     wo_ref, bo_ref,
                     out_ref):
    """One batch tile of the Generator MLP.

    Matmuls take bf16 operands with f32 MXU accumulation; bias add, ReLU and
    tanh are done in f32.  The fingerprint/feature heads are fused into a
    single lane-dense output matmul (wo = [Wf | Wp]), stored as bf16.
    """
    x = noise_ref[...].astype(jnp.bfloat16)                  # (tile, noise_dim)

    # input_layer: Linear + ReLU (+ Dropout == identity at eval)
    h = jnp.dot(x, w1_ref[...], preferred_element_type=jnp.float32) + b1_ref[...]
    h = jnp.maximum(h, 0.0)

    # hidden_layer: (Linear + ReLU + Dropout) x 2
    h = jnp.dot(h.astype(jnp.bfloat16), w2_ref[...],
                preferred_element_type=jnp.float32) + b2_ref[...]
    h = jnp.maximum(h, 0.0)
    h = jnp.dot(h.astype(jnp.bfloat16), w3_ref[...],
                preferred_element_type=jnp.float32) + b3_ref[...]
    h = jnp.maximum(h, 0.0)

    # fused output heads: single Linear + Tanh over [Wf | Wp]
    y = jnp.dot(h.astype(jnp.bfloat16), wo_ref[...],
                preferred_element_type=jnp.float32) + bo_ref[...]
    out_ref[...] = jnp.tanh(y).astype(out_ref.dtype)


def generator_forward(noise, params, *, batch_tile=1024):
    """Run the Generator forward pass as a single fused Pallas kernel,
    tiled over the batch dimension (ragged final tile handled by Pallas)."""
    (w1, b1), (w2, b2), (w3, b3), (wf, bf), (wp, bp) = params
    B, noise_dim = noise.shape
    hidden_dim = w1.shape[1]
    fingerprint_dim = wf.shape[1]
    feature_dim = wp.shape[1]

    # ---- lane padding (weights only; noise stays un-padded) ----------------
    hidden_dim_p = _round_up(hidden_dim, LANE)
    out_dim = fingerprint_dim + feature_dim
    out_dim_p = _round_up(out_dim, LANE)

    def pad2(a, rows, cols):
        return jnp.pad(a, ((0, rows - a.shape[0]), (0, cols - a.shape[1])))

    # Fused output head: one lane-dense weight/bias.
    wo = jnp.concatenate([wf, wp], axis=1)
    bo = jnp.concatenate([bf, bp], axis=1)

    # bf16 weights for the MXU; biases stay f32.  (All tiny: ~130 KiB total.)
    w1p = pad2(w1, noise_dim, hidden_dim_p).astype(jnp.bfloat16)
    w2p = pad2(w2, hidden_dim_p, hidden_dim_p).astype(jnp.bfloat16)
    w3p = pad2(w3, hidden_dim_p, hidden_dim_p).astype(jnp.bfloat16)
    wop = pad2(wo, hidden_dim_p, out_dim_p).astype(jnp.bfloat16)
    b1p = pad2(b1, 1, hidden_dim_p).astype(jnp.float32)
    b2p = pad2(b2, 1, hidden_dim_p).astype(jnp.float32)
    b3p = pad2(b3, 1, hidden_dim_p).astype(jnp.float32)
    bop = pad2(bo, 1, out_dim_p).astype(jnp.float32)

    # ---- batch tiling (no explicit pad; Pallas masks the ragged last tile) --
    tile = _pick_batch_tile(B, batch_tile)
    grid = (pl.cdiv(B, tile),)

    def rep(a):  # replicated (constant-index) full-array block
        return pl.BlockSpec(a.shape, lambda i: (0, 0))

    in_specs = [
        pl.BlockSpec((tile, noise_dim), lambda i: (i, 0)),   # noise, un-padded
        rep(w1p), rep(b1p),
        rep(w2p), rep(b2p),
        rep(w3p), rep(b3p),
        rep(wop), rep(bop),
    ]
    out_specs = pl.BlockSpec((tile, out_dim_p), lambda i: (i, 0))
    out_shape = jax.ShapeDtypeStruct((B, out_dim_p), jnp.bfloat16)

    flops = 2 * B * (noise_dim * hidden_dim_p
                     + 2 * hidden_dim_p * hidden_dim_p
                     + hidden_dim_p * out_dim_p)
    transcendentals = B * out_dim_p
    bytes_accessed = int(
        B * noise_dim * 4                                  # f32 noise read
        + sum(int(a.size) * int(a.dtype.itemsize)
              for a in (w1p, w2p, w3p, wop, b1p, b2p, b3p, bop))
        + B * out_dim_p * 2)                               # bf16 output write

    fused = pl.pallas_call(
        generator_kernel,
        grid=grid,
        in_specs=in_specs,
        out_specs=out_specs,
        out_shape=out_shape,
        compiler_params=pltpu.CompilerParams(
            dimension_semantics=("parallel",)),
        cost_estimate=pl.CostEstimate(flops=flops,
                                      transcendentals=transcendentals,
                                      bytes_accessed=bytes_accessed),
    )(noise, w1p, b1p, w2p, b2p, w3p, b3p, wop, bop)

    fingerprint = fused[:, :fingerprint_dim]
    features = fused[:, fingerprint_dim:fingerprint_dim + feature_dim]
    return {"fingerprint": fingerprint, "features": features}


def init_generator_params(key, noise_dim, fingerprint_dim, feature_dim,
                          hidden_dim=128):
    """Deterministic parameter init.  Weights are (in, out)."""
    keys = jax.random.split(key, 10)

    def linear(kw, kb, fan_in, fan_out):
        # Mimic PyTorch's default U(-1/sqrt(fan_in), 1/sqrt(fan_in))
        bound = 1.0 / jnp.sqrt(fan_in)
        w = jax.random.uniform(kw, (fan_in, fan_out), jnp.float32,
                               minval=-bound, maxval=bound)
        b = jax.random.uniform(kb, (1, fan_out), jnp.float32,
                               minval=-bound, maxval=bound)
        return w, b

    p1 = linear(keys[0], keys[1], noise_dim, hidden_dim)
    p2 = linear(keys[2], keys[3], hidden_dim, hidden_dim)
    p3 = linear(keys[4], keys[5], hidden_dim, hidden_dim)
    pf = linear(keys[6], keys[7], hidden_dim, fingerprint_dim)
    pp = linear(keys[8], keys[9], hidden_dim, feature_dim)
    return (p1, p2, p3, pf, pp)


def _reference_forward_f32(noise, params):
    """Pure f32 reference (PyTorch semantics)."""
    (w1, b1), (w2, b2), (w3, b3), (wf, bf), (wp, bp) = params
    h = jnp.maximum(noise @ w1 + b1, 0.0)
    h = jnp.maximum(h @ w2 + b2, 0.0)
    h = jnp.maximum(h @ w3 + b3, 0.0)
    return {"fingerprint": jnp.tanh(h @ wf + bf),
            "features": jnp.tanh(h @ wp + bp)}


def _reference_forward_bf16(noise, params):
    """Plain-JAX reference using the same precision policy as the kernel
    (bf16 matmul operands, f32 accumulation / bias / activations)."""
    (w1, b1), (w2, b2), (w3, b3), (wf, bf), (wp, bp) = params

    def dot_bf16(a, b):
        return jnp.dot(a.astype(jnp.bfloat16), b.astype(jnp.bfloat16),
                       preferred_element_type=jnp.float32)

    h = jnp.maximum(dot_bf16(noise, w1) + b1, 0.0)
    h = jnp.maximum(dot_bf16(h, w2) + b2, 0.0)
    h = jnp.maximum(dot_bf16(h, w3) + b3, 0.0)
    return {"fingerprint": jnp.tanh(dot_bf16(h, wf) + bf),
            "features": jnp.tanh(dot_bf16(h, wp) + bp)}


if __name__ == "__main__":
    # Small shapes consistent with the module (hidden_dim = module default 128).
    batch = 500                 # deliberately not a multiple of the batch tile
    noise_dim = 16
    fingerprint_dim = 64
    feature_dim = 8
    hidden_dim = 128

    key = jax.random.PRNGKey(0)
    k_noise, k_params = jax.random.split(key)

    noise = jax.random.normal(k_noise, (batch, noise_dim), dtype=jnp.float32)
    params = init_generator_params(k_params, noise_dim, fingerprint_dim,
                                   feature_dim, hidden_dim)

    out = generator_forward(noise, params)   # tile=256 -> grid=(2,), ragged tail
    jax.block_until_ready(out)

    assert out["fingerprint"].shape == (batch, fingerprint_dim)
    assert out["features"].shape == (batch, feature_dim)

    # Check vs a reference with the same bf16-matmul policy (kernel output is
    # bf16, so allow ~1 ulp of bf16 on values in [-1, 1]).
    ref = _reference_forward_bf16(noise, params)
    assert jnp.allclose(out["fingerprint"].astype(jnp.float32),
                        ref["fingerprint"], atol=1e-2)
    assert jnp.allclose(out["features"].astype(jnp.float32),
                        ref["features"], atol=1e-2)

    # Loose sanity check vs the full-f32 (PyTorch-semantics) reference.
    ref32 = _reference_forward_f32(noise, params)
    assert jnp.allclose(out["fingerprint"].astype(jnp.float32),
                        ref32["fingerprint"], atol=1e-1)
    assert jnp.allclose(out["features"].astype(jnp.float32),
                        ref32["features"], atol=1e-1)

    print("KERNEL_OK")
</pallas_src>

<mosaic_0001>
module attributes {stable_mosaic.version = 11 : i64} {
  func.func @generator_kernel(%arg0: i32, %arg1: memref<256x16xf32, #tpu.memory_space<vmem>>, %arg2: memref<16x128xbf16, #tpu.memory_space<vmem>>, %arg3: memref<1x128xf32, #tpu.memory_space<vmem>>, %arg4: memref<128x128xbf16, #tpu.memory_space<vmem>>, %arg5: memref<1x128xf32, #tpu.memory_space<vmem>>, %arg6: memref<128x128xbf16, #tpu.memory_space<vmem>>, %arg7: memref<1x128xf32, #tpu.memory_space<vmem>>, %arg8: memref<128x128xbf16, #tpu.memory_space<vmem>>, %arg9: memref<1x128xf32, #tpu.memory_space<vmem>>, %arg10: memref<256x128xbf16, #tpu.memory_space<vmem>>) attributes {dimension_semantics = [#tpu.dimension_semantics<parallel>], iteration_bounds = array<i64: 2>, scalar_prefetch = 0 : i64, scratch_operands = 0 : i64, tpu.core_type = #tpu.core_type<tc>, window_params = [{transform_indices = @transform_0, window_bounds = array<i64: 256, 16>}, {pipeline_mode = #tpu.pipeline_mode<synchronous>, transform_indices = @transform_1, window_bounds = array<i64: 16, 128>}, {pipeline_mode = #tpu.pipeline_mode<synchronous>, transform_indices = @transform_2, window_bounds = array<i64: 1, 128>}, {pipeline_mode = #tpu.pipeline_mode<synchronous>, transform_indices = @transform_3, window_bounds = array<i64: 128, 128>}, {pipeline_mode = #tpu.pipeline_mode<synchronous>, transform_indices = @transform_4, window_bounds = array<i64: 1, 128>}, {pipeline_mode = #tpu.pipeline_mode<synchronous>, transform_indices = @transform_5, window_bounds = array<i64: 128, 128>}, {pipeline_mode = #tpu.pipeline_mode<synchronous>, transform_indices = @transform_6, window_bounds = array<i64: 1, 128>}, {pipeline_mode = #tpu.pipeline_mode<synchronous>, transform_indices = @transform_7, window_bounds = array<i64: 128, 128>}, {pipeline_mode = #tpu.pipeline_mode<synchronous>, transform_indices = @transform_8, window_bounds = array<i64: 1, 128>}, {transform_indices = @transform_9, window_bounds = array<i64: 256, 128>}]} {
    %c0 = arith.constant 0 : index
    %c0_0 = arith.constant 0 : index
    %0 = vector.load %arg1[%c0, %c0_0] : memref<256x16xf32, #tpu.memory_space<vmem>>, vector<256x16xf32>
    %1 = arith.truncf %0 : vector<256x16xf32> to vector<256x16xbf16>
    %c0_1 = arith.constant 0 : index
    %c0_2 = arith.constant 0 : index
    %2 = vector.load %arg2[%c0_1, %c0_2] : memref<16x128xbf16, #tpu.memory_space<vmem>>, vector<16x128xbf16>
    %cst = arith.constant dense<0.000000e+00> : vector<256x128xf32>
    %3 = tpu.matmul %1, %2, %cst {dimension_numbers = #tpu.dot_dimension_numbers<[1], [0], [0], [1], [0, 0, 1, 1], [], []>} : vector<256x16xbf16>, vector<16x128xbf16>, vector<256x128xf32> -> vector<256x128xf32>
    %c0_3 = arith.constant 0 : index
    %c0_4 = arith.constant 0 : index
    %4 = vector.load %arg3[%c0_3, %c0_4] : memref<1x128xf32, #tpu.memory_space<vmem>>, vector<1x128xf32>
    %5 = vector.broadcast %4 : vector<1x128xf32> to vector<256x128xf32>
    %6 = arith.addf %3, %5 : vector<256x128xf32>
    %cst_5 = arith.constant 0.000000e+00 : f32
    %7 = vector.broadcast %cst_5 : f32 to vector<256x128xf32>
    %8 = arith.maximumf %6, %7 : vector<256x128xf32>
    %9 = arith.truncf %8 : vector<256x128xf32> to vector<256x128xbf16>
    %c0_6 = arith.constant 0 : index
    %c0_7 = arith.constant 0 : index
    %10 = vector.load %arg4[%c0_6, %c0_7] : memref<128x128xbf16, #tpu.memory_space<vmem>>, vector<128x128xbf16>
    %cst_8 = arith.constant dense<0.000000e+00> : vector<256x128xf32>
    %11 = tpu.matmul %9, %10, %cst_8 {dimension_numbers = #tpu.dot_dimension_numbers<[1], [0], [0], [1], [0, 0, 1, 1], [], []>} : vector<256x128xbf16>, vector<128x128xbf16>, vector<256x128xf32> -> vector<256x128xf32>
    %c0_9 = arith.constant 0 : index
    %c0_10 = arith.constant 0 : index
    %12 = vector.load %arg5[%c0_9, %c0_10] : memref<1x128xf32, #tpu.memory_space<vmem>>, vector<1x128xf32>
    %13 = vector.broadcast %12 : vector<1x128xf32> to vector<256x128xf32>
    %14 = arith.addf %11, %13 : vector<256x128xf32>
    %cst_11 = arith.constant 0.000000e+00 : f32
    %15 = vector.broadcast %cst_11 : f32 to vector<256x128xf32>
    %16 = arith.maximumf %14, %15 : vector<256x128xf32>
    %17 = arith.truncf %16 : vector<256x128xf32> to vector<256x128xbf16>
    %c0_12 = arith.constant 0 : index
    %c0_13 = arith.constant 0 : index
    %18 = vector.load %arg6[%c0_12, %c0_13] : memref<128x128xbf16, #tpu.memory_space<vmem>>, vector<128x128xbf16>
    %cst_14 = arith.constant dense<0.000000e+00> : vector<256x128xf32>
    %19 = tpu.matmul %17, %18, %cst_14 {dimension_numbers = #tpu.dot_dimension_numbers<[1], [0], [0], [1], [0, 0, 1, 1], [], []>} : vector<256x128xbf16>, vector<128x128xbf16>, vector<256x128xf32> -> vector<256x128xf32>
    %c0_15 = arith.constant 0 : index
    %c0_16 = arith.constant 0 : index
    %20 = vector.load %arg7[%c0_15, %c0_16] : memref<1x128xf32, #tpu.memory_space<vmem>>, vector<1x128xf32>
    %21 = vector.broadcast %20 : vector<1x128xf32> to vector<256x128xf32>
    %22 = arith.addf %19, %21 : vector<256x128xf32>
    %cst_17 = arith.constant 0.000000e+00 : f32
    %23 = vector.broadcast %cst_17 : f32 to vector<256x128xf32>
    %24 = arith.maximumf %22, %23 : vector<256x128xf32>
    %25 = arith.truncf %24 : vector<256x128xf32> to vector<256x128xbf16>
    %c0_18 = arith.constant 0 : index
    %c0_19 = arith.constant 0 : index
    %26 = vector.load %arg8[%c0_18, %c0_19] : memref<128x128xbf16, #tpu.memory_space<vmem>>, vector<128x128xbf16>
    %cst_20 = arith.constant dense<0.000000e+00> : vector<256x128xf32>
    %27 = tpu.matmul %25, %26, %cst_20 {dimension_numbers = #tpu.dot_dimension_numbers<[1], [0], [0], [1], [0, 0, 1, 1], [], []>} : vector<256x128xbf16>, vector<128x128xbf16>, vector<256x128xf32> -> vector<256x128xf32>
    %c0_21 = arith.constant 0 : index
    %c0_22 = arith.constant 0 : index
    %28 = vector.load %arg9[%c0_21, %c0_22] : memref<1x128xf32, #tpu.memory_space<vmem>>, vector<1x128xf32>
    %29 = vector.broadcast %28 : vector<1x128xf32> to vector<256x128xf32>
    %30 = arith.addf %27, %29 : vector<256x128xf32>
    %31 = math.tanh %30 : vector<256x128xf32>
    %32 = arith.truncf %31 : vector<256x128xf32> to vector<256x128xbf16>
    %c0_23 = arith.constant 0 : index
    %c0_24 = arith.constant 0 : index
    %33 = vector.load %arg10[%c0_23, %c0_24] : memref<256x128xbf16, #tpu.memory_space<vmem>>, vector<256x128xbf16>
    tpu.vector_store %arg10[%c0_23, %c0_24], %32 {strides = array<i32>} : memref<256x128xbf16, #tpu.memory_space<vmem>>, vector<256x128xbf16>,
    return
  }
  func.func @transform_0(%arg0: i32) -> (i32, i32) {
    %c0_i32 = arith.constant 0 : i32
    %c0_i32_0 = arith.constant 0 : i32
    return %arg0, %c0_i32 : i32, i32
  }
  func.func @transform_1(%arg0: i32) -> (i32, i32) {
    %c0_i32 = arith.constant 0 : i32
    %c0_i32_0 = arith.constant 0 : i32
    %c0_i32_1 = arith.constant 0 : i32
    return %c0_i32, %c0_i32_0 : i32, i32
  }
  func.func @transform_2(%arg0: i32) -> (i32, i32) {
    %c0_i32 = arith.constant 0 : i32
    %c0_i32_0 = arith.constant 0 : i32
    %c0_i32_1 = arith.constant 0 : i32
    return %c0_i32, %c0_i32_0 : i32, i32
  }
  func.func @transform_3(%arg0: i32) -> (i32, i32) {
    %c0_i32 = arith.constant 0 : i32
    %c0_i32_0 = arith.constant 0 : i32
    %c0_i32_1 = arith.constant 0 : i32
    return %c0_i32, %c0_i32_0 : i32, i32
  }
  func.func @transform_4(%arg0: i32) -> (i32, i32) {
    %c0_i32 = arith.constant 0 : i32
    %c0_i32_0 = arith.constant 0 : i32
    %c0_i32_1 = arith.constant 0 : i32
    return %c0_i32, %c0_i32_0 : i32, i32
  }
  func.func @transform_5(%arg0: i32) -> (i32, i32) {
    %c0_i32 = arith.constant 0 : i32
    %c0_i32_0 = arith.constant 0 : i32
    %c0_i32_1 = arith.constant 0 : i32
    return %c0_i32, %c0_i32_0 : i32, i32
  }
  func.func @transform_6(%arg0: i32) -> (i32, i32) {
    %c0_i32 = arith.constant 0 : i32
    %c0_i32_0 = arith.constant 0 : i32
    %c0_i32_1 = arith.constant 0 : i32
    return %c0_i32, %c0_i32_0 : i32, i32
  }
  func.func @transform_7(%arg0: i32) -> (i32, i32) {
    %c0_i32 = arith.constant 0 : i32
    %c0_i32_0 = arith.constant 0 : i32
    %c0_i32_1 = arith.constant 0 : i32
    return %c0_i32, %c0_i32_0 : i32, i32
  }
  func.func @transform_8(%arg0: i32) -> (i32, i32) {
    %c0_i32 = arith.constant 0 : i32
    %c0_i32_0 = arith.constant 0 : i32
    %c0_i32_1 = arith.constant 0 : i32
    return %c0_i32, %c0_i32_0 : i32, i32
  }
  func.func @transform_9(%arg0: i32) -> (i32, i32) {
    %c0_i32 = arith.constant 0 : i32
    %c0_i32_0 = arith.constant 0 : i32
    return %arg0, %c0_i32 : i32, i32
  }
}

</mosaic_0001>

<bundles_post_ra>
// kernel: tpu_custom_call.1
= control target key start
LH: loop header
LB: loop body
LE: loop exit
PB: predicated region body
PF: predicated region fallthrough
CT: control target
= control target key end

     0   :  { %14 = vsyncpa [#allocation3], 0  ;;  %s2924_s0 = inlined_call_operand.vmem [shape: f32[500,16], index: 0, kind: input, shape index: {}]   ;;  %s2925_s1 = inlined_call_operand.vmem [shape: bf16[16,128], index: 1, kind: input, shape index: {}]   ;;  %s2926_s2 = inlined_call_operand.vmem [shape: f32[1,128], index: 2, kind: input, shape index: {}]   ;;  %s2927_s3 = inlined_call_operand.vmem [shape: bf16[128,128], index: 3, kind: input, shape index: {}]   ;;  %s2928_s4 = inlined_call_operand.vmem [shape: f32[1,128], index: 4, kind: input, shape index: {}]   ;;  %s2929_s5 = inlined_call_operand.vmem [shape: bf16[128,128], index: 5, kind: input, shape index: {}]   ;;  %s2930_s6 = inlined_call_operand.vmem [shape: f32[1,128], index: 6, kind: input, shape index: {}]   ;;  %s2931_s7 = inlined_call_operand.vmem [shape: bf16[128,128], index: 7, kind: input, shape index: {}]   ;;  %s2932_s8 = inlined_call_operand.vmem [shape: f32[1,128], index: 8, kind: input, shape index: {}]   ;;  %s2933_s9 = inlined_call_operand.hbm [shape: bf16[500,128], index: 9, kind: output, shape index: {}]  }
   0x1   :  { %16 = vsyncpa [#allocation3 + $0x1], 0  ;;  %s2494_s30 = smov 0   ;;  %s2496_s10 = smov 0  }
   0x2   :  { %s2498_s11 = smov 0   ;;  %s2500_s12 = smov 0  }
   0x3 LB: > { %s2515_s13 = sadd.s32 4294967295, %s2439_s12   ;;  %s1746_s14 = sadd.s32 4294967294, %s2439_s12   ;;  %s2439_s12 = sphi %s2500_s12, %s2939_s12   ;;  %s2435_s11 = sphi %s2498_s11, %s2938_s11   ;;  %s2431_s10 = sphi %s2496_s10, %s2937_s10   ;;  %s2427_s30 = sphi %s2494_s30, %s2936_s30  }
   0x4   : > { %s2519_s15 = sadd.s32 1, %s2439_s12   ;;  %s223_s16 = sadd.s32 1, %s2435_s11 }
   0x5   : > { %s220_s17 = ssub.s32 %s2439_s12, %s2519_s15  ;;  %p233_p0 = scmp.ne.s32.totalorder %s2435_s11, %s2431_s10 }
   0x6   : > { %p221_p1 = scmp.eq.s32.totalorder %s220_s17, 0  ;;  %p234_p2 = scmp.eq.s32.totalorder %s2515_s13, 1 }
   0x7   : > { %p239_p3 = scmp.ne.s32.totalorder %s2431_s10, %s2427_s30  ;;  %p240_p4 = scmp.eq.s32.totalorder %s1746_s14, 1 }
   0x8   : > { %s2530_s18 = scalar_select %p221_p1, %s2435_s11, %s223_s16  }
   0x9   : > { %p2532_p5 = por %p234_p2, %p233_p0  ;;  %p2536_p6 = por %p240_p4, %p239_p3 }
   0xa   : > { %p1749_p7 = scmp.ge.s32.totalorder %s2439_s12, 1  ;;  %p299_p8 = scmp.lt.s32.totalorder %s2439_s12, 3 }
   0xc   : > { %p300_p9 = pnand %p1749_p7, %p299_p8 }
   0xd   : > { %s2546_s23 = sshll.u32 (!%p300_p9), %s2515_s13, 5  ;;  %s336_s28 = sand.u32 (!%p300_p9), 1, %s2431_s10  }
   0xe   : > { %303 = sbr.rel (%p300_p9) target bundleno = 946 (0x3b2), region = 56  ;;  %p344_p10 = scmp.lt.s32.totalorder (!%p300_p9), %s2546_s23, 62 }
   0xf   : > { %s1750_s16 = sshll.u32 (!%p300_p9), %s336_s28, 7  ;;  %s2864_s22 = scalar_lea.sflag (!%p300_p9), [#allocation3], %s336_s28 }
  0x10   : > { %s2823_s21 = scalar_lea.vmem (!%p300_p9), [#allocation2], %s1750_s16 }
  0x13   : > { %v2290_v0 = vld [vmem:[%s2925_s1] sm:$0xff]   ;;  %v2291_v1 = vld [vmem:[%s2927_s3 + $0x38] sm:$0xff]   ;;  %s345_s26 = scalar_select %p344_p10, %s2546_s23, 62  ;;  %v2292_v2 = vld [vmem:[%s2927_s3 + $0x30] sm:$0xff]   ;;  %vm422_vm0 = vcmask 130048  }
  0x14   : > { %2056 = vmatprep.subr.bf16.mxu0 %v2290_v0  ;;  %2090 = vmatprep.subr.bf16.mxu1 %v2291_v1  ;;  %v2293_v3 = vld [vmem:[%s2927_s3 + $0x28] sm:$0xff]   ;;  %v2294_v13 = vld [vmem:[%s2927_s3 + $0x20] sm:$0xff]   ;;  %v2295_v18 = vld [vmem:[%s2927_s3 + $0x18] sm:$0xff]  }
  0x15   : > { %2057 = vmatpush3.bf16.msra.mxu0 %v2290_v0  ;;  %s1752_s29 = sshll.u32 %s345_s26, 3  ;;  %2091 = vmatpush3.bf16.msra.mxu1 %v2291_v1  ;;  %v2296_v54 = vld [vmem:[%s2927_s3 + $0x10] sm:$0xff]   ;;  %v2297_v55 = vld [vmem:[%s2927_s3 + $0x8] sm:$0xff]   ;;  %v2298_v56 = vld [vmem:[%s2927_s3] sm:$0xff]  }
  0x16   : > { %s2559_s17 = scalar_lea.vmem %s2924_s0, %s1752_s29  ;;  %2092 = vmatprep.subr.bf16.mxu1 %v2292_v2  ;;  %v2299_v57 = vld [vmem:[%s2929_s5 + $0x38] sm:$0xff]   ;;  %v2300_v58 = vld [vmem:[%s2929_s5 + $0x30] sm:$0xff]   ;;  %v2301_v59 = vld [vmem:[%s2929_s5 + $0x28] sm:$0xff]  }
  0x17   : > { %v359_v4 = vld [vmem:[%s2559_s17] sm:$0xff]  ;;  %v360_v5 = vld [vmem:[%s2559_s17 + $0x8] sm:$0xff]  ;;  %v361_v6 = vld [vmem:[%s2559_s17 + $0x10] sm:$0xff]  ;;  %2138 = vmatprep.subr.bf16.mxu0 %v2299_v57 }
  0x18   : > { %v391_v7 = vpack.c.bf16 %v360_v5, %v359_v4  ;;  %v362_v8 = vld [vmem:[%s2559_s17 + $0x18] sm:$0xff]  ;;  %v363_v9 = vld [vmem:[%s2559_s17 + $0x20] sm:$0xff]  ;;  %v364_v10 = vld [vmem:[%s2559_s17 + $0x28] sm:$0xff] }
  0x19   : > { %v392_v11 = vpack.c.bf16 %v362_v8, %v361_v6  ;;  %v393_v12 = vpack.c.bf16 %v364_v10, %v363_v9  ;;  %2093 = vmatpush3.bf16.msra.mxu1 %v2292_v2  ;;  %v365_v14 = vld [vmem:[%s2559_s17 + $0x30] sm:$0xff]  ;;  %v366_v15 = vld [vmem:[%s2559_s17 + $0x38] sm:$0xff]  ;;  %v367_v16 = vld [vmem:[%s2559_s17 + $0x40] sm:$0xff] }
  0x1a   : > { %2058 = vmatprep.mubr.msk.bf16.mxu0 %vm422_vm0, %v391_v7  ;;  %2094 = vmatprep.subr.bf16.mxu1 %v2293_v3  ;;  %v368_v17 = vld [vmem:[%s2559_s17 + $0x48] sm:$0xff]  ;;  %v394_v19 = vpack.c.bf16 %v366_v15, %v365_v14  ;;  %v369_v21 = vld [vmem:[%s2559_s17 + $0x50] sm:$0xff]  ;;  %v370_v22 = vld [vmem:[%s2559_s17 + $0x58] sm:$0xff] }
  0x1b   : > { %2059 = vmatmul.mubr.msk.bf16.vlgmr.msra.gmra.mxu0 %vm422_vm0, %v392_v11  ;;  %v395_v20 = vpack.c.bf16 %v368_v17, %v367_v16  ;;  %v371_v23 = vld [vmem:[%s2559_s17 + $0x60] sm:$0xff]  ;;  %v372_v24 = vld [vmem:[%s2559_s17 + $0x68] sm:$0xff]  ;;  %v396_v25 = vpack.c.bf16 %v370_v22, %v369_v21  ;;  %v373_v27 = vld [vmem:[%s2559_s17 + $0x70] sm:$0xff] }
  0x1c   : > { %2062 = vmatprep.mubr.msk.bf16.mxu0 %vm422_vm0, %v393_v12  ;;  %v397_v26 = vpack.c.bf16 %v372_v24, %v371_v23  ;;  %v374_v28 = vld [vmem:[%s2559_s17 + $0x78] sm:$0xff]  ;;  %v375_v29 = vld [vmem:[%s2559_s17 + $0x80] sm:$0xff]  ;;  %v376_v30 = vld [vmem:[%s2559_s17 + $0x88] sm:$0xff]  ;;  %2139 = vmatpush3.bf16.msra.mxu0 %v2299_v57 }
  0x1d   : > { %2095 = vmatpush3.bf16.msra.mxu1 %v2293_v3  ;;  %v398_v31 = vpack.c.bf16 %v374_v28, %v373_v27  ;;  %v399_v32 = vpack.c.bf16 %v376_v30, %v375_v29  ;;  %v377_v33 = vld [vmem:[%s2559_s17 + $0x90] sm:$0xff]  ;;  %v378_v34 = vld [vmem:[%s2559_s17 + $0x98] sm:$0xff]  ;;  %v379_v35 = vld [vmem:[%s2559_s17 + $0xa0] sm:$0xff]  ;;  %2140 = vmatprep.subr.bf16.mxu0 %v2300_v58 }
  0x1e   : > { %2096 = vmatprep.subr.bf16.mxu1 %v2294_v13  ;;  %v380_v36 = vld [vmem:[%s2559_s17 + $0xa8] sm:$0xff]  ;;  %v400_v37 = vpack.c.bf16 %v378_v34, %v377_v33  ;;  %v381_v39 = vld [vmem:[%s2559_s17 + $0xb0] sm:$0xff]  ;;  %v382_v40 = vld [vmem:[%s2559_s17 + $0xb8] sm:$0xff] }
  0x1f   : > { %v401_v38 = vpack.c.bf16 %v380_v36, %v379_v35  ;;  %v383_v41 = vld [vmem:[%s2559_s17 + $0xc0] sm:$0xff]  ;;  %v384_v42 = vld [vmem:[%s2559_s17 + $0xc8] sm:$0xff]  ;;  %v402_v43 = vpack.c.bf16 %v382_v40, %v381_v39  ;;  %v385_v45 = vld [vmem:[%s2559_s17 + $0xd0] sm:$0xff] }
  0x20   : > { %v403_v44 = vpack.c.bf16 %v384_v42, %v383_v41  ;;  %v386_v46 = vld [vmem:[%s2559_s17 + $0xd8] sm:$0xff]  ;;  %v387_v47 = vld [vmem:[%s2559_s17 + $0xe0] sm:$0xff]  ;;  %v388_v48 = vld [vmem:[%s2559_s17 + $0xe8] sm:$0xff]  ;;  %2141 = vmatpush3.bf16.msra.mxu0 %v2300_v58 }
  0x21   : > { %2097 = vmatpush3.bf16.msra.mxu1 %v2294_v13  ;;  %v404_v49 = vpack.c.bf16 %v386_v46, %v385_v45  ;;  %v405_v50 = vpack.c.bf16 %v388_v48, %v387_v47  ;;  %v389_v51 = vld [vmem:[%s2559_s17 + $0xf0] sm:$0xff]  ;;  %v390_v52 = vld [vmem:[%s2559_s17 + $0xf8] sm:$0xff]  ;;  %2142 = vmatprep.subr.bf16.mxu0 %v2301_v59  ;;  %v2302_v60 = vld [vmem:[%s2929_s5 + $0x20] sm:$0xff]   ;;  %s1673_s17 = ssub.s32 (%p2532_p5), 63, %s2546_s23 }
  0x22   : > { %2098 = vmatprep.subr.bf16.mxu1 %v2295_v18  ;;  %v406_v53 = vpack.c.bf16 %v390_v52, %v389_v51  ;;  %v2303_v61 = vld [vmem:[%s2929_s5 + $0x18] sm:$0xff]   ;;  %v2304_v62 = vld [vmem:[%s2929_s5 + $0x10] sm:$0xff]   ;;  %v2305_v63 = vld [vmem:[%s2929_s5 + $0x8] sm:$0xff]   ;;  %p1674_p11 = scmp.lt.s32.totalorder (%p2532_p5), %s1673_s17, 32 }
  0x23   : > { %2063 = vmatmul.mubr.msk.bf16.gmra.mxu0 %vm422_vm0, %v394_v19  ;;  %v2651_v2 = vld [vmem:[%s2926_s2] ss:$0 sm:$0xff] }
  0x24   : > { %2066 = vmatprep.mubr.msk.bf16.mxu0 %vm422_vm0, %v395_v20  ;;  %2143 = vmatpush3.bf16.msra.mxu0 %v2301_v59 }
  0x25   : > { %2099 = vmatpush3.bf16.msra.mxu1 %v2295_v18  ;;  %2144 = vmatprep.subr.bf16.mxu0 %v2302_v60 }
  0x26   : > { %2100 = vmatprep.subr.bf16.mxu1 %v2296_v54 }
  0x28   : > { %2145 = vmatpush3.bf16.msra.mxu0 %v2302_v60 }
  0x29   : > { %2101 = vmatpush3.bf16.msra.mxu1 %v2296_v54  ;;  %2146 = vmatprep.subr.bf16.mxu0 %v2303_v61 }
  0x2a   : > { %2102 = vmatprep.subr.bf16.mxu1 %v2297_v55 }
  0x2b   : > { %2067 = vmatmul.mubr.msk.bf16.gmra.mxu0 %vm422_vm0, %v396_v25 }
  0x2c   : > { %2070 = vmatprep.mubr.msk.bf16.mxu0 %vm422_vm0, %v397_v26  ;;  %2147 = vmatpush3.bf16.msra.mxu0 %v2303_v61 }
  0x2d   : > { %2103 = vmatpush3.bf16.msra.mxu1 %v2297_v55  ;;  %2148 = vmatprep.subr.bf16.mxu0 %v2304_v62 }
  0x2e   : > { %2104 = vmatprep.subr.bf16.mxu1 %v2298_v56 }
  0x30   : > { %2149 = vmatpush3.bf16.msra.mxu0 %v2304_v62 }
  0x31   : > { %2105 = vmatpush3.bf16.msra.mxu1 %v2298_v56  ;;  %2150 = vmatprep.subr.bf16.mxu0 %v2305_v63 }
  0x33   : > { %2071 = vmatmul.mubr.msk.bf16.gmra.mxu0 %vm422_vm0, %v398_v31 }
  0x34   : > { %2074 = vmatprep.mubr.msk.bf16.mxu0 %vm422_vm0, %v399_v32  ;;  %2151 = vmatpush3.bf16.msra.mxu0 %v2305_v63 }
  0x3b   : > { %2075 = vmatmul.mubr.msk.bf16.gmra.mxu0 %vm422_vm0, %v400_v37 }
  0x3c   : > { %2078 = vmatprep.mubr.msk.bf16.mxu0 %vm422_vm0, %v401_v38 }
  0x43   : > { %2079 = vmatmul.mubr.msk.bf16.gmra.mxu0 %vm422_vm0, %v402_v43 }
  0x44   : > { %2082 = vmatprep.mubr.msk.bf16.mxu0 %vm422_vm0, %v403_v44 }
  0x4b   : > { %2083 = vmatmul.mubr.msk.bf16.gmra.mxu0 %vm422_vm0, %v404_v49 }
  0x4c   : > { %2086 = vmatprep.mubr.msk.bf16.mxu0 %vm422_vm0, %v405_v50 }
  0x53   : > { %2087 = vmatmul.mubr.msk.bf16.gmra.mxu0 %vm422_vm0, %v406_v53 }
  0xdb   : > { %v2060_v0 = vpop.f32.mrf.mxu0 }
  0xdc   : > { %v514_v6 = vadd.f32 %v2060_v0, %v2651_v2 }
  0xdd   : > { %v505_v1 = vpop.f32.mrf.mxu0 }
  0xde   : > { %v506_v4 = vadd.f32 %v2651_v2, %v505_v1  ;;  %v634_v13 = vmax.f32 %v514_v6, 0.0 }
  0xdf   : > { %v2061_v3 = vpop.f32.mrf.mxu0 }
  0xe0   : > { %v517_v5 = vadd.f32 %v2061_v3, %v2651_v2  ;;  %v632_v11 = vmax.f32 %v506_v4, 0.0 }
  0xe1   : > { %v508_v7 = vpop.f32.mrf.mxu0 }
  0xe2   : > { %v509_v8 = vadd.f32 %v2651_v2, %v508_v7  ;;  %v635_v9 = vmax.f32 %v517_v5, 0.0 }
  0xe3   : > { %v2064_v10 = vpop.f32.mrf.mxu0 }
  0xe4   : > { %v633_v12 = vmax.f32 %v509_v8, 0.0  ;;  %v665_v16 = vpack.c.bf16 %v635_v9, %v634_v13  ;;  %v530_v20 = vadd.f32 %v2064_v10, %v2651_v2 }
  0xe5   : > { %v521_v14 = vpop.f32.mrf.mxu0 }
  0xe6   : > { %v664_v15 = vpack.c.bf16 %v633_v12, %v632_v11  ;;  %v522_v18 = vadd.f32 %v2651_v2, %v521_v14  ;;  %v638_v27 = vmax.f32 %v530_v20, 0.0 }
  0xe7   : > { %v2065_v17 = vpop.f32.mrf.mxu0 }
  0xe8   : > { %v533_v19 = vadd.f32 %v2065_v17, %v2651_v2  ;;  %2106 = vmatprep.mubr.bf16.mxu1 %v664_v15  ;;  %v636_v25 = vmax.f32 %v522_v18, 0.0 }
  0xe9   : > { %v524_v21 = vpop.f32.mrf.mxu0  ;;  %2107 = vmatmul.mubr.bf16.vlgmr.msra.gmra.mxu1 %v665_v16 }
  0xea   : > { %v525_v22 = vadd.f32 %v2651_v2, %v524_v21  ;;  %v639_v23 = vmax.f32 %v533_v19, 0.0 }
  0xeb   : > { %v2068_v24 = vpop.f32.mrf.mxu0 }
  0xec   : > { %v637_v26 = vmax.f32 %v525_v22, 0.0  ;;  %v667_v30 = vpack.c.bf16 %v639_v23, %v638_v27  ;;  %v546_v34 = vadd.f32 %v2068_v24, %v2651_v2 }
  0xed   : > { %v537_v28 = vpop.f32.mrf.mxu0 }
  0xee   : > { %v666_v29 = vpack.c.bf16 %v637_v26, %v636_v25  ;;  %v538_v32 = vadd.f32 %v2651_v2, %v537_v28  ;;  %v642_v41 = vmax.f32 %v546_v34, 0.0 }
  0xef   : > { %v2069_v31 = vpop.f32.mrf.mxu0 }
  0xf0   : > { %v549_v33 = vadd.f32 %v2069_v31, %v2651_v2  ;;  %2110 = vmatprep.mubr.bf16.mxu1 %v666_v29  ;;  %v640_v39 = vmax.f32 %v538_v32, 0.0 }
  0xf1   : > { %v540_v35 = vpop.f32.mrf.mxu0  ;;  %2111 = vmatmul.mubr.bf16.gmra.mxu1 %v667_v30 }
  0xf2   : > { %v541_v36 = vadd.f32 %v2651_v2, %v540_v35  ;;  %v643_v37 = vmax.f32 %v549_v33, 0.0 }
  0xf3   : > { %v2072_v38 = vpop.f32.mrf.mxu0 }
  0xf4   : > { %v641_v40 = vmax.f32 %v541_v36, 0.0  ;;  %v669_v44 = vpack.c.bf16 %v643_v37, %v642_v41  ;;  %v562_v48 = vadd.f32 %v2072_v38, %v2651_v2 }
  0xf5   : > { %v553_v42 = vpop.f32.mrf.mxu0 }
  0xf6   : > { %v668_v43 = vpack.c.bf16 %v641_v40, %v640_v39  ;;  %v554_v46 = vadd.f32 %v2651_v2, %v553_v42  ;;  %v646_v55 = vmax.f32 %v562_v48, 0.0 }
  0xf7   : > { %v2073_v45 = vpop.f32.mrf.mxu0 }
  0xf8   : > { %v565_v47 = vadd.f32 %v2073_v45, %v2651_v2  ;;  %2114 = vmatprep.mubr.bf16.mxu1 %v668_v43  ;;  %v644_v53 = vmax.f32 %v554_v46, 0.0 }
  0xf9   : > { %v556_v49 = vpop.f32.mrf.mxu0  ;;  %2115 = vmatmul.mubr.bf16.gmra.mxu1 %v669_v44 }
  0xfa   : > { %v557_v50 = vadd.f32 %v2651_v2, %v556_v49  ;;  %v647_v51 = vmax.f32 %v565_v47, 0.0 }
  0xfb   : > { %v2076_v52 = vpop.f32.mrf.mxu0 }
  0xfc   : > { %v645_v54 = vmax.f32 %v557_v50, 0.0  ;;  %v671_v58 = vpack.c.bf16 %v647_v51, %v646_v55  ;;  %v578_v62 = vadd.f32 %v2076_v52, %v2651_v2  ;;  %v2306_v50 = vld [vmem:[%s2929_s5] sm:$0xff]   ;;  %v2307_v51 = vld [vmem:[%s2931_s7 + $0x38] sm:$0xff]   ;;  %v2309_v52 = vld [vmem:[%s2931_s7 + $0x28] sm:$0xff]  }
  0xfd   : > { %v569_v56 = vpop.f32.mrf.mxu0  ;;  %2152 = vmatprep.subr.bf16.mxu0 %v2306_v50  ;;  %2234 = vmatprep.subr.bf16.mxu1 %v2307_v51  ;;  %v2713_v55 = vld [vmem:[%s2931_s7 + $0x10] sm:$0xff]  }
  0xfe   : > { %v670_v57 = vpack.c.bf16 %v645_v54, %v644_v53  ;;  %v570_v60 = vadd.f32 %v2651_v2, %v569_v56  ;;  %v650_v6 = vmax.f32 %v578_v62, 0.0  ;;  %2153 = vmatpush3.bf16.msra.mxu0 %v2306_v50  ;;  %2242 = vmatpush3.bf16.msra.mxu1 %v2307_v51  ;;  %v2700_v53 = vld [vmem:[%s2931_s7 + $0x20] sm:$0xff]   ;;  %v2706_v54 = vld [vmem:[%s2931_s7 + $0x18] sm:$0xff]  }
  0xff   : > { %v2077_v59 = vpop.f32.mrf.mxu0  ;;  %2186 = vmatprep.subr.bf16.mxu0 %v2307_v51 }
 0x100   : > { %v581_v61 = vadd.f32 %v2077_v59, %v2651_v2  ;;  %2118 = vmatprep.mubr.bf16.mxu1 %v670_v57  ;;  %v648_v4 = vmax.f32 %v570_v60, 0.0 }
 0x101   : > { %v572_v63 = vpop.f32.mrf.mxu0  ;;  %2119 = vmatmul.mubr.bf16.gmra.mxu1 %v671_v58  ;;  %v2721_v58 = vld [vmem:[%s2928_s4] ss:$0 sm:$0xff] }
 0x102   : > { %v573_v0 = vadd.f32 %v2651_v2, %v572_v63  ;;  %v651_v1 = vmax.f32 %v581_v61, 0.0 }
 0x103   : > { %v2080_v3 = vpop.f32.mrf.mxu0 }
 0x104   : > { %v649_v5 = vmax.f32 %v573_v0, 0.0  ;;  %v673_v9 = vpack.c.bf16 %v651_v1, %v650_v6  ;;  %v594_v13 = vadd.f32 %v2080_v3, %v2651_v2 }
 0x105   : > { %v585_v7 = vpop.f32.mrf.mxu0 }
 0x106   : > { %v672_v8 = vpack.c.bf16 %v649_v5, %v648_v4  ;;  %v586_v11 = vadd.f32 %v2651_v2, %v585_v7  ;;  %v654_v20 = vmax.f32 %v594_v13, 0.0 }
 0x107   : > { %v2081_v10 = vpop.f32.mrf.mxu0 }
 0x108   : > { %v597_v12 = vadd.f32 %v2081_v10, %v2651_v2  ;;  %2122 = vmatprep.mubr.bf16.mxu1 %v672_v8  ;;  %v652_v18 = vmax.f32 %v586_v11, 0.0 }
 0x109   : > { %v588_v14 = vpop.f32.mrf.mxu0  ;;  %2123 = vmatmul.mubr.bf16.gmra.mxu1 %v673_v9 }
 0x10a   : > { %v589_v15 = vadd.f32 %v2651_v2, %v588_v14  ;;  %v655_v16 = vmax.f32 %v597_v12, 0.0 }
 0x10b   : > { %v2084_v17 = vpop.f32.mrf.mxu0 }
 0x10c   : > { %v653_v19 = vmax.f32 %v589_v15, 0.0  ;;  %v675_v23 = vpack.c.bf16 %v655_v16, %v654_v20  ;;  %v610_v27 = vadd.f32 %v2084_v17, %v2651_v2 }
 0x10d   : > { %v601_v21 = vpop.f32.mrf.mxu0 }
 0x10e   : > { %v674_v22 = vpack.c.bf16 %v653_v19, %v652_v18  ;;  %v602_v25 = vadd.f32 %v2651_v2, %v601_v21  ;;  %v658_v34 = vmax.f32 %v610_v27, 0.0 }
 0x10f   : > { %v2085_v24 = vpop.f32.mrf.mxu0 }
 0x110   : > { %v613_v26 = vadd.f32 %v2085_v24, %v2651_v2  ;;  %2126 = vmatprep.mubr.bf16.mxu1 %v674_v22  ;;  %v656_v32 = vmax.f32 %v602_v25, 0.0 }
 0x111   : > { %v604_v28 = vpop.f32.mrf.mxu0  ;;  %2127 = vmatmul.mubr.bf16.gmra.mxu1 %v675_v23 }
 0x112   : > { %v605_v29 = vadd.f32 %v2651_v2, %v604_v28  ;;  %v659_v30 = vmax.f32 %v613_v26, 0.0 }
 0x113   : > { %v2088_v31 = vpop.f32.mrf.mxu0 }
 0x114   : > { %v657_v33 = vmax.f32 %v605_v29, 0.0  ;;  %v677_v37 = vpack.c.bf16 %v659_v30, %v658_v34  ;;  %v626_v41 = vadd.f32 %v2088_v31, %v2651_v2 }
 0x115   : > { %v617_v35 = vpop.f32.mrf.mxu0 }
 0x116   : > { %v676_v36 = vpack.c.bf16 %v657_v33, %v656_v32  ;;  %v618_v39 = vadd.f32 %v2651_v2, %v617_v35  ;;  %v662_v47 = vmax.f32 %v626_v41, 0.0 }
 0x117   : > { %v2089_v38 = vpop.f32.mrf.mxu0 }
 0x118   : > { %v629_v40 = vadd.f32 %v2089_v38, %v2651_v2  ;;  %2130 = vmatprep.mubr.bf16.mxu1 %v676_v36  ;;  %v660_v45 = vmax.f32 %v618_v39, 0.0 }
 0x119   : > { %v620_v42 = vpop.f32.mrf.mxu0  ;;  %2131 = vmatmul.mubr.bf16.gmra.mxu1 %v677_v37 }
 0x11a   : > { %v621_v43 = vadd.f32 %v2651_v2, %v620_v42  ;;  %v663_v44 = vmax.f32 %v629_v40, 0.0  ;;  %v2308_v2 = vld [vmem:[%s2931_s7 + $0x30] sm:$0xff]  }
 0x11b   : > { %2235 = vmatprep.subr.bf16.mxu1 %v2308_v2 }
 0x11c   : > { %v661_v46 = vmax.f32 %v621_v43, 0.0  ;;  %v679_v49 = vpack.c.bf16 %v663_v44, %v662_v47  ;;  %2243 = vmatpush3.bf16.msra.mxu1 %v2308_v2 }
 0x11d   : > { %2236 = vmatprep.subr.bf16.mxu1 %v2309_v52 }
 0x11e   : > { %v678_v48 = vpack.c.bf16 %v661_v46, %v660_v45 }
 0x120   : > { %2134 = vmatprep.mubr.bf16.mxu1 %v678_v48  ;;  %2244 = vmatpush3.bf16.msra.mxu1 %v2309_v52 }
 0x121   : > { %2135 = vmatmul.mubr.bf16.gmra.mxu1 %v679_v49  ;;  %2237 = vmatprep.subr.bf16.mxu1 %v2700_v53 }
 0x124   : > { %2245 = vmatpush3.bf16.msra.mxu1 %v2700_v53 }
 0x125   : > { %2238 = vmatprep.subr.bf16.mxu1 %v2706_v54 }
 0x128   : > { %2246 = vmatpush3.bf16.msra.mxu1 %v2706_v54 }
 0x129   : > { %2239 = vmatprep.subr.bf16.mxu1 %v2713_v55 }
 0x12c   : > { %2247 = vmatpush3.bf16.msra.mxu1 %v2713_v55 }
 0x1a9   : > { %v2108_v56 = vpop.f32.mrf.mxu1 }
 0x1aa   : > { %v794_v62 = vadd.f32 %v2108_v56, %v2721_v58 }
 0x1ab   : > { %v785_v57 = vpop.f32.mrf.mxu1 }
 0x1ac   : > { %v786_v60 = vadd.f32 %v2721_v58, %v785_v57  ;;  %v914_v6 = vmax.f32 %v794_v62, 0.0 }
 0x1ad   : > { %v2109_v59 = vpop.f32.mrf.mxu1 }
 0x1ae   : > { %v797_v61 = vadd.f32 %v2109_v59, %v2721_v58  ;;  %v912_v4 = vmax.f32 %v786_v60, 0.0 }
 0x1af   : > { %v788_v63 = vpop.f32.mrf.mxu1 }
 0x1b0   : > { %v789_v0 = vadd.f32 %v2721_v58, %v788_v63  ;;  %v915_v1 = vmax.f32 %v797_v61, 0.0 }
 0x1b1   : > { %v2112_v3 = vpop.f32.mrf.mxu1 }
 0x1b2   : > { %v913_v5 = vmax.f32 %v789_v0, 0.0  ;;  %v945_v9 = vpack.c.bf16 %v915_v1, %v914_v6  ;;  %v810_v13 = vadd.f32 %v2112_v3, %v2721_v58 }
 0x1b3   : > { %v801_v7 = vpop.f32.mrf.mxu1 }
 0x1b4   : > { %v944_v8 = vpack.c.bf16 %v913_v5, %v912_v4  ;;  %v802_v11 = vadd.f32 %v2721_v58, %v801_v7  ;;  %v918_v20 = vmax.f32 %v810_v13, 0.0 }
 0x1b5   : > { %v2113_v10 = vpop.f32.mrf.mxu1 }
 0x1b6   : > { %v813_v12 = vadd.f32 %v2113_v10, %v2721_v58  ;;  %2154 = vmatprep.mubr.bf16.mxu0 %v944_v8  ;;  %v916_v18 = vmax.f32 %v802_v11, 0.0 }
 0x1b7   : > { %v804_v14 = vpop.f32.mrf.mxu1  ;;  %2155 = vmatmul.mubr.bf16.vlgmr.msra.gmra.mxu0 %v945_v9 }
 0x1b8   : > { %v805_v15 = vadd.f32 %v2721_v58, %v804_v14  ;;  %2187 = vmatpush3.bf16.msra.mxu0 %v2307_v51  ;;  %v919_v16 = vmax.f32 %v813_v12, 0.0 }
 0x1b9   : > { %v2116_v17 = vpop.f32.mrf.mxu1  ;;  %2188 = vmatprep.subr.bf16.mxu0 %v2308_v2 }
 0x1ba   : > { %v917_v19 = vmax.f32 %v805_v15, 0.0  ;;  %v947_v23 = vpack.c.bf16 %v919_v16, %v918_v20  ;;  %v826_v27 = vadd.f32 %v2116_v17, %v2721_v58 }
 0x1bb   : > { %v817_v21 = vpop.f32.mrf.mxu1 }
 0x1bc   : > { %v946_v22 = vpack.c.bf16 %v917_v19, %v916_v18  ;;  %2189 = vmatpush3.bf16.msra.mxu0 %v2308_v2  ;;  %v818_v25 = vadd.f32 %v2721_v58, %v817_v21  ;;  %v922_v34 = vmax.f32 %v826_v27, 0.0 }
 0x1bd   : > { %v2117_v24 = vpop.f32.mrf.mxu1  ;;  %2190 = vmatprep.subr.bf16.mxu0 %v2309_v52 }
 0x1be   : > { %v829_v26 = vadd.f32 %v2117_v24, %v2721_v58  ;;  %2158 = vmatprep.mubr.bf16.mxu0 %v946_v22  ;;  %v920_v32 = vmax.f32 %v818_v25, 0.0 }
 0x1bf   : > { %v820_v28 = vpop.f32.mrf.mxu1  ;;  %2159 = vmatmul.mubr.bf16.gmra.mxu0 %v947_v23 }
 0x1c0   : > { %v821_v29 = vadd.f32 %v2721_v58, %v820_v28  ;;  %2191 = vmatpush3.bf16.msra.mxu0 %v2309_v52  ;;  %v923_v30 = vmax.f32 %v829_v26, 0.0 }
 0x1c1   : > { %v2120_v31 = vpop.f32.mrf.mxu1  ;;  %2192 = vmatprep.subr.bf16.mxu0 %v2700_v53 }
 0x1c2   : > { %v921_v33 = vmax.f32 %v821_v29, 0.0  ;;  %v949_v37 = vpack.c.bf16 %v923_v30, %v922_v34  ;;  %v842_v41 = vadd.f32 %v2120_v31, %v2721_v58 }
 0x1c3   : > { %v833_v35 = vpop.f32.mrf.mxu1 }
 0x1c4   : > { %v948_v36 = vpack.c.bf16 %v921_v33, %v920_v32  ;;  %2193 = vmatpush3.bf16.msra.mxu0 %v2700_v53  ;;  %v834_v39 = vadd.f32 %v2721_v58, %v833_v35  ;;  %v926_v48 = vmax.f32 %v842_v41, 0.0 }
 0x1c5   : > { %v2121_v38 = vpop.f32.mrf.mxu1  ;;  %2194 = vmatprep.subr.bf16.mxu0 %v2706_v54 }
 0x1c6   : > { %v845_v40 = vadd.f32 %v2121_v38, %v2721_v58  ;;  %2162 = vmatprep.mubr.bf16.mxu0 %v948_v36  ;;  %v924_v46 = vmax.f32 %v834_v39, 0.0 }
 0x1c7   : > { %v836_v42 = vpop.f32.mrf.mxu1  ;;  %2163 = vmatmul.mubr.bf16.gmra.mxu0 %v949_v37 }
 0x1c8   : > { %v837_v43 = vadd.f32 %v2721_v58, %v836_v42  ;;  %2195 = vmatpush3.bf16.msra.mxu0 %v2706_v54  ;;  %v927_v44 = vmax.f32 %v845_v40, 0.0 }
 0x1c9   : > { %v2124_v45 = vpop.f32.mrf.mxu1  ;;  %2196 = vmatprep.subr.bf16.mxu0 %v2713_v55 }
 0x1ca   : > { %v925_v47 = vmax.f32 %v837_v43, 0.0  ;;  %v951_v51 = vpack.c.bf16 %v927_v44, %v926_v48  ;;  %v858_v54 = vadd.f32 %v2124_v45, %v2721_v58  ;;  %v2313_v43 = vld [vmem:[%s2931_s7 + $0x8] sm:$0xff]  }
 0x1cb   : > { %v849_v49 = vpop.f32.mrf.mxu1  ;;  %2240 = vmatprep.subr.bf16.mxu1 %v2313_v43 }
 0x1cc   : > { %v950_v50 = vpack.c.bf16 %v925_v47, %v924_v46  ;;  %2197 = vmatpush3.bf16.msra.mxu0 %v2713_v55  ;;  %v850_v52 = vadd.f32 %v2721_v58, %v849_v49  ;;  %v930_v63 = vmax.f32 %v858_v54, 0.0  ;;  %2248 = vmatpush3.bf16.msra.mxu1 %v2313_v43  ;;  %v2770_v46 = vld [vmem:[%s2930_s6] ss:$0 sm:$0xff] }
 0x1cd   : > { %v2125_v2 = vpop.f32.mrf.mxu1  ;;  %2198 = vmatprep.subr.bf16.mxu0 %v2313_v43 }
 0x1ce   : > { %v861_v53 = vadd.f32 %v2125_v2, %v2721_v58  ;;  %2166 = vmatprep.mubr.bf16.mxu0 %v950_v50  ;;  %v928_v61 = vmax.f32 %v850_v52, 0.0 }
 0x1cf   : > { %v852_v56 = vpop.f32.mrf.mxu1  ;;  %2167 = vmatmul.mubr.bf16.gmra.mxu0 %v951_v51 }
 0x1d0   : > { %v853_v57 = vadd.f32 %v2721_v58, %v852_v56  ;;  %v931_v59 = vmax.f32 %v861_v53, 0.0  ;;  %2199 = vmatpush3.bf16.msra.mxu0 %v2313_v43 }
 0x1d1   : > { %v2128_v60 = vpop.f32.mrf.mxu1 }
 0x1d2   : > { %v929_v62 = vmax.f32 %v853_v57, 0.0  ;;  %v953_v1 = vpack.c.bf16 %v931_v59, %v930_v63  ;;  %v874_v6 = vadd.f32 %v2128_v60, %v2721_v58 }
 0x1d3   : > { %v865_v0 = vpop.f32.mrf.mxu1 }
 0x1d4   : > { %v952_v55 = vpack.c.bf16 %v929_v62, %v928_v61  ;;  %v866_v4 = vadd.f32 %v2721_v58, %v865_v0  ;;  %v934_v13 = vmax.f32 %v874_v6, 0.0 }
 0x1d5   : > { %v2129_v3 = vpop.f32.mrf.mxu1 }
 0x1d6   : > { %v877_v5 = vadd.f32 %v2129_v3, %v2721_v58  ;;  %2170 = vmatprep.mubr.bf16.mxu0 %v952_v55  ;;  %v932_v11 = vmax.f32 %v866_v4, 0.0 }
 0x1d7   : > { %v868_v7 = vpop.f32.mrf.mxu1  ;;  %2171 = vmatmul.mubr.bf16.gmra.mxu0 %v953_v1 }
 0x1d8   : > { %v869_v8 = vadd.f32 %v2721_v58, %v868_v7  ;;  %v935_v9 = vmax.f32 %v877_v5, 0.0 }
 0x1d9   : > { %v2132_v10 = vpop.f32.mrf.mxu1 }
 0x1da   : > { %v933_v12 = vmax.f32 %v869_v8, 0.0  ;;  %v955_v16 = vpack.c.bf16 %v935_v9, %v934_v13  ;;  %v890_v20 = vadd.f32 %v2132_v10, %v2721_v58 }
 0x1db   : > { %v881_v14 = vpop.f32.mrf.mxu1 }
 0x1dc   : > { %v954_v15 = vpack.c.bf16 %v933_v12, %v932_v11  ;;  %v882_v18 = vadd.f32 %v2721_v58, %v881_v14  ;;  %v938_v27 = vmax.f32 %v890_v20, 0.0 }
 0x1dd   : > { %v2133_v17 = vpop.f32.mrf.mxu1 }
 0x1de   : > { %v893_v19 = vadd.f32 %v2133_v17, %v2721_v58  ;;  %2174 = vmatprep.mubr.bf16.mxu0 %v954_v15  ;;  %v936_v25 = vmax.f32 %v882_v18, 0.0 }
 0x1df   : > { %v884_v21 = vpop.f32.mrf.mxu1  ;;  %2175 = vmatmul.mubr.bf16.gmra.mxu0 %v955_v16 }
 0x1e0   : > { %v885_v22 = vadd.f32 %v2721_v58, %v884_v21  ;;  %v939_v23 = vmax.f32 %v893_v19, 0.0 }
 0x1e1   : > { %v2136_v24 = vpop.f32.mrf.mxu1 }
 0x1e2   : > { %v937_v26 = vmax.f32 %v885_v22, 0.0  ;;  %v957_v30 = vpack.c.bf16 %v939_v23, %v938_v27  ;;  %v906_v34 = vadd.f32 %v2136_v24, %v2721_v58 }
 0x1e3   : > { %v897_v28 = vpop.f32.mrf.mxu1 }
 0x1e4   : > { %v956_v29 = vpack.c.bf16 %v937_v26, %v936_v25  ;;  %v898_v32 = vadd.f32 %v2721_v58, %v897_v28  ;;  %v942_v40 = vmax.f32 %v906_v34, 0.0 }
 0x1e5   : > { %v2137_v31 = vpop.f32.mrf.mxu1 }
 0x1e6   : > { %v909_v33 = vadd.f32 %v2137_v31, %v2721_v58  ;;  %2178 = vmatprep.mubr.bf16.mxu0 %v956_v29  ;;  %v940_v38 = vmax.f32 %v898_v32, 0.0 }
 0x1e7   : > { %v900_v35 = vpop.f32.mrf.mxu1  ;;  %2179 = vmatmul.mubr.bf16.gmra.mxu0 %v957_v30 }
 0x1e8   : > { %v901_v36 = vadd.f32 %v2721_v58, %v900_v35  ;;  %v943_v37 = vmax.f32 %v909_v33, 0.0  ;;  %v2314_v58 = vld [vmem:[%s2931_s7] sm:$0xff]  }
 0x1e9   : > { %2200 = vmatprep.subr.bf16.mxu0 %v2314_v58  ;;  %2241 = vmatprep.subr.bf16.mxu1 %v2314_v58 }
 0x1ea   : > { %v941_v39 = vmax.f32 %v901_v36, 0.0  ;;  %v959_v42 = vpack.c.bf16 %v943_v37, %v942_v40  ;;  %2201 = vmatpush3.bf16.msra.mxu0 %v2314_v58  ;;  %2249 = vmatpush3.bf16.msra.mxu1 %v2314_v58 }
 0x1ec   : > { %v958_v41 = vpack.c.bf16 %v941_v39, %v940_v38 }
 0x1ee   : > { %2182 = vmatprep.mubr.bf16.mxu0 %v958_v41 }
 0x1ef   : > { %2183 = vmatmul.mubr.bf16.gmra.mxu0 %v959_v42 }
 0x277   : > { %v2156_v44 = vpop.f32.mrf.mxu0 }
 0x278   : > { %v1074_v50 = vadd.f32 %v2156_v44, %v2770_v46 }
 0x279   : > { %v1065_v45 = vpop.f32.mrf.mxu0 }
 0x27a   : > { %v1066_v48 = vadd.f32 %v2770_v46, %v1065_v45  ;;  %v1194_v57 = vmax.f32 %v1074_v50, 0.0 }
 0x27b   : > { %v2157_v47 = vpop.f32.mrf.mxu0 }
 0x27c   : > { %v1077_v49 = vadd.f32 %v2157_v47, %v2770_v46  ;;  %v1192_v54 = vmax.f32 %v1066_v48, 0.0 }
 0x27d   : > { %v1068_v51 = vpop.f32.mrf.mxu0 }
 0x27e   : > { %v1069_v2 = vadd.f32 %v2770_v46, %v1068_v51  ;;  %v1195_v52 = vmax.f32 %v1077_v49, 0.0 }
 0x27f   : > { %v2160_v53 = vpop.f32.mrf.mxu0 }
 0x280   : > { %v1193_v56 = vmax.f32 %v1069_v2, 0.0  ;;  %v1225_v61 = vpack.c.bf16 %v1195_v52, %v1194_v57  ;;  %v1090_v55 = vadd.f32 %v2160_v53, %v2770_v46 }
 0x281   : > { %v1081_v59 = vpop.f32.mrf.mxu0 }
 0x282   : > { %v1224_v60 = vpack.c.bf16 %v1193_v56, %v1192_v54  ;;  %v1082_v63 = vadd.f32 %v2770_v46, %v1081_v59  ;;  %v1198_v8 = vmax.f32 %v1090_v55, 0.0 }
 0x283   : > { %v2161_v62 = vpop.f32.mrf.mxu0 }
 0x284   : > { %v1093_v0 = vadd.f32 %v2161_v62, %v2770_v46  ;;  %2202 = vmatprep.mubr.bf16.mxu0 %v1224_v60  ;;  %v1196_v6 = vmax.f32 %v1082_v63, 0.0 }
 0x285   : > { %v1084_v1 = vpop.f32.mrf.mxu0  ;;  %2203 = vmatmul.mubr.bf16.vlgmr.msra.gmra.mxu0 %v1225_v61 }
 0x286   : > { %v1085_v3 = vadd.f32 %v2770_v46, %v1084_v1  ;;  %v1199_v4 = vmax.f32 %v1093_v0, 0.0 }
 0x287   : > { %v2164_v5 = vpop.f32.mrf.mxu0 }
 0x288   : > { %v1197_v7 = vmax.f32 %v1085_v3, 0.0  ;;  %v1227_v11 = vpack.c.bf16 %v1199_v4, %v1198_v8  ;;  %v1106_v15 = vadd.f32 %v2164_v5, %v2770_v46 }
 0x289   : > { %v1097_v9 = vpop.f32.mrf.mxu0 }
 0x28a   : > { %v1226_v10 = vpack.c.bf16 %v1197_v7, %v1196_v6  ;;  %v1098_v13 = vadd.f32 %v2770_v46, %v1097_v9  ;;  %v1202_v22 = vmax.f32 %v1106_v15, 0.0 }
 0x28b   : > { %v2165_v12 = vpop.f32.mrf.mxu0 }
 0x28c   : > { %v1109_v14 = vadd.f32 %v2165_v12, %v2770_v46  ;;  %2206 = vmatprep.mubr.bf16.mxu1 %v1226_v10  ;;  %v1200_v20 = vmax.f32 %v1098_v13, 0.0 }
 0x28d   : > { %v1100_v16 = vpop.f32.mrf.mxu0  ;;  %2207 = vmatmul.mubr.bf16.vlgmr.msra.gmra.mxu1 %v1227_v11 }
 0x28e   : > { %v1101_v17 = vadd.f32 %v2770_v46, %v1100_v16  ;;  %v1203_v18 = vmax.f32 %v1109_v14, 0.0 }
 0x28f   : > { %v2168_v19 = vpop.f32.mrf.mxu0 }
 0x290   : > { %v1201_v21 = vmax.f32 %v1101_v17, 0.0  ;;  %v1229_v25 = vpack.c.bf16 %v1203_v18, %v1202_v22  ;;  %v1122_v29 = vadd.f32 %v2168_v19, %v2770_v46 }
 0x291   : > { %v1113_v23 = vpop.f32.mrf.mxu0 }
 0x292   : > { %v1228_v24 = vpack.c.bf16 %v1201_v21, %v1200_v20  ;;  %v1114_v27 = vadd.f32 %v2770_v46, %v1113_v23  ;;  %v1206_v36 = vmax.f32 %v1122_v29, 0.0 }
 0x293   : > { %v2169_v26 = vpop.f32.mrf.mxu0 }
 0x294   : > { %v1125_v28 = vadd.f32 %v2169_v26, %v2770_v46  ;;  %2210 = vmatprep.mubr.bf16.mxu1 %v1228_v24  ;;  %v1204_v34 = vmax.f32 %v1114_v27, 0.0 }
 0x295   : > { %v1116_v30 = vpop.f32.mrf.mxu0  ;;  %2211 = vmatmul.mubr.bf16.gmra.mxu1 %v1229_v25 }
 0x296   : > { %v1117_v31 = vadd.f32 %v2770_v46, %v1116_v30  ;;  %v1207_v32 = vmax.f32 %v1125_v28, 0.0 }
 0x297   : > { %v2172_v33 = vpop.f32.mrf.mxu0 }
 0x298   : > { %v1205_v35 = vmax.f32 %v1117_v31, 0.0  ;;  %v1231_v39 = vpack.c.bf16 %v1207_v32, %v1206_v36  ;;  %v1138_v43 = vadd.f32 %v2172_v33, %v2770_v46  ;;  %v2808_v31 = vld [vmem:[%s2932_s8] ss:$0 sm:$0xff] }
 0x299   : > { %v1129_v37 = vpop.f32.mrf.mxu0 }
 0x29a   : > { %v1230_v38 = vpack.c.bf16 %v1205_v35, %v1204_v34  ;;  %v1130_v41 = vadd.f32 %v2770_v46, %v1129_v37  ;;  %v1210_v50 = vmax.f32 %v1138_v43, 0.0 }
 0x29b   : > { %v2173_v40 = vpop.f32.mrf.mxu0 }
 0x29c   : > { %v1141_v42 = vadd.f32 %v2173_v40, %v2770_v46  ;;  %2214 = vmatprep.mubr.bf16.mxu1 %v1230_v38  ;;  %v1208_v48 = vmax.f32 %v1130_v41, 0.0 }
 0x29d   : > { %v1132_v58 = vpop.f32.mrf.mxu0  ;;  %2215 = vmatmul.mubr.bf16.gmra.mxu1 %v1231_v39 }
 0x29e   : > { %v1133_v44 = vadd.f32 %v2770_v46, %v1132_v58  ;;  %v1211_v45 = vmax.f32 %v1141_v42, 0.0 }
 0x29f   : > { %v2176_v47 = vpop.f32.mrf.mxu0 }
 0x2a0   : > { %v1209_v49 = vmax.f32 %v1133_v44, 0.0  ;;  %v1233_v52 = vpack.c.bf16 %v1211_v45, %v1210_v50  ;;  %v1154_v57 = vadd.f32 %v2176_v47, %v2770_v46 }
 0x2a1   : > { %v1145_v51 = vpop.f32.mrf.mxu0 }
 0x2a2   : > { %v1232_v2 = vpack.c.bf16 %v1209_v49, %v1208_v48  ;;  %v1146_v54 = vadd.f32 %v2770_v46, %v1145_v51  ;;  %v1214_v55 = vmax.f32 %v1154_v57, 0.0 }
 0x2a3   : > { %v2177_v53 = vpop.f32.mrf.mxu0 }
 0x2a4   : > { %v1157_v56 = vadd.f32 %v2177_v53, %v2770_v46  ;;  %2218 = vmatprep.mubr.bf16.mxu1 %v1232_v2  ;;  %v1212_v63 = vmax.f32 %v1146_v54, 0.0 }
 0x2a5   : > { %v1148_v59 = vpop.f32.mrf.mxu0  ;;  %2219 = vmatmul.mubr.bf16.gmra.mxu1 %v1233_v52 }
 0x2a6   : > { %v1149_v60 = vadd.f32 %v2770_v46, %v1148_v59  ;;  %v1215_v61 = vmax.f32 %v1157_v56, 0.0 }
 0x2a7   : > { %v2180_v62 = vpop.f32.mrf.mxu0 }
 0x2a8   : > { %v1213_v0 = vmax.f32 %v1149_v60, 0.0  ;;  %v1235_v4 = vpack.c.bf16 %v1215_v61, %v1214_v55  ;;  %v1170_v8 = vadd.f32 %v2180_v62, %v2770_v46 }
 0x2a9   : > { %v1161_v1 = vpop.f32.mrf.mxu0 }
 0x2aa   : > { %v1234_v3 = vpack.c.bf16 %v1213_v0, %v1212_v63  ;;  %v1162_v6 = vadd.f32 %v2770_v46, %v1161_v1  ;;  %v1218_v15 = vmax.f32 %v1170_v8, 0.0 }
 0x2ab   : > { %v2181_v5 = vpop.f32.mrf.mxu0 }
 0x2ac   : > { %v1173_v7 = vadd.f32 %v2181_v5, %v2770_v46  ;;  %2222 = vmatprep.mubr.bf16.mxu1 %v1234_v3  ;;  %v1216_v13 = vmax.f32 %v1162_v6, 0.0 }
 0x2ad   : > { %v1164_v9 = vpop.f32.mrf.mxu0  ;;  %2223 = vmatmul.mubr.bf16.gmra.mxu1 %v1235_v4 }
 0x2ae   : > { %v1165_v10 = vadd.f32 %v2770_v46, %v1164_v9  ;;  %v1219_v11 = vmax.f32 %v1173_v7, 0.0 }
 0x2af   : > { %v2184_v12 = vpop.f32.mrf.mxu0 }
 0x2b0   : > { %v1217_v14 = vmax.f32 %v1165_v10, 0.0  ;;  %v1237_v18 = vpack.c.bf16 %v1219_v11, %v1218_v15  ;;  %v1186_v22 = vadd.f32 %v2184_v12, %v2770_v46 }
 0x2b1   : > { %v1177_v16 = vpop.f32.mrf.mxu0 }
 0x2b2   : > { %v1236_v17 = vpack.c.bf16 %v1217_v14, %v1216_v13  ;;  %v1178_v20 = vadd.f32 %v2770_v46, %v1177_v16  ;;  %v1222_v28 = vmax.f32 %v1186_v22, 0.0 }
 0x2b3   : > { %v2185_v19 = vpop.f32.mrf.mxu0 }
 0x2b4   : > { %v1189_v21 = vadd.f32 %v2185_v19, %v2770_v46  ;;  %2226 = vmatprep.mubr.bf16.mxu1 %v1236_v17  ;;  %v1220_v26 = vmax.f32 %v1178_v20, 0.0 }
 0x2b5   : > { %v1180_v23 = vpop.f32.mrf.mxu0  ;;  %2227 = vmatmul.mubr.bf16.gmra.mxu1 %v1237_v18 }
 0x2b6   : > { %v1181_v24 = vadd.f32 %v2770_v46, %v1180_v23  ;;  %v1223_v25 = vmax.f32 %v1189_v21, 0.0 }
 0x2b8   : > { %v1221_v27 = vmax.f32 %v1181_v24, 0.0  ;;  %v1239_v30 = vpack.c.bf16 %v1223_v25, %v1222_v28 }
 0x2ba   : > { %v1238_v29 = vpack.c.bf16 %v1221_v27, %v1220_v26 }
 0x2bc   : > { %2230 = vmatprep.mubr.bf16.mxu1 %v1238_v29 }
 0x2bd   : > { %2231 = vmatmul.mubr.bf16.gmra.mxu1 %v1239_v30 }
 0x345   : > { %v2204_v32 = vpop.f32.mrf.mxu0 }
 0x346   : > { %v1354_v33 = vadd.f32 %v2204_v32, %v2808_v31 }
 0x347   : > { %v1345_v34 = vpop.f32.mrf.mxu0 }
 0x348   : > { %v1346_v46 = vadd.f32 %v2808_v31, %v1345_v34  ;;  %2315 = vtanh.f32 %v1354_v33 }
 0x349   : > { %v2205_v35 = vpop.f32.mrf.mxu0 }
 0x34a   : > { %v1357_v36 = vadd.f32 %v2205_v35, %v2808_v31 }
 0x34b   : > { %v1348_v37 = vpop.f32.mrf.mxu0 }
 0x34c   : > { %2317 = vtanh.f32 %v1357_v36  ;;  %v1349_v38 = vadd.f32 %v2808_v31, %v1348_v37 }
 0x34d   : > { %2319 = vtanh.f32 %v1346_v46  ;;  %v2208_v39 = vpop.f32.mrf.mxu1 }
 0x34e   : > { %2321 = vtanh.f32 %v1349_v38  ;;  %v1370_v40 = vadd.f32 %v2208_v39, %v2808_v31 }
 0x34f   : > { %v1361_v41 = vpop.f32.mrf.mxu1 }
 0x350   : > { %v1362_v42 = vadd.f32 %v2808_v31, %v1361_v41  ;;  %2323 = vtanh.f32 %v1370_v40 }
 0x351   : > { %v2209_v43 = vpop.f32.mrf.mxu1 }
 0x352   : > { %v1373_v58 = vadd.f32 %v2209_v43, %v2808_v31 }
 0x353   : > { %v1364_v44 = vpop.f32.mrf.mxu1 }
 0x354   : > { %2325 = vtanh.f32 %v1373_v58  ;;  %v1365_v45 = vadd.f32 %v2808_v31, %v1364_v44 }
 0x355   : > { %2327 = vtanh.f32 %v1362_v42  ;;  %v2212_v47 = vpop.f32.mrf.mxu1  ;;  %v2316_v50 = vpop.eup %2315 }
 0x356   : > { %2329 = vtanh.f32 %v1365_v45  ;;  %v1386_v48 = vadd.f32 %v2212_v47, %v2808_v31 }
 0x357   : > { %v1377_v49 = vpop.f32.mrf.mxu1 }
 0x358   : > { %v1378_v2 = vadd.f32 %v2808_v31, %v1377_v49  ;;  %2331 = vtanh.f32 %v1386_v48 }
 0x359   : > { %v2318_v51 = vpop.eup %2317  ;;  %v2213_v52 = vpop.f32.mrf.mxu1 }
 0x35a   : > { %v2320_v53 = vpop.eup %2319  ;;  %v1880_v54 = vpack.c.bf16 %v2318_v51, %v2316_v50  ;;  %v1389_v56 = vadd.f32 %v2213_v52, %v2808_v31 }
 0x35b   : > { %v2322_v57 = vpop.eup %2321  ;;  %v1380_v59 = vpop.f32.mrf.mxu1 }
 0x35c   : > { %1952 = vst [vmem:[%s2823_s21 + $0x8] sm:$0xff] %v1880_v54   ;;  %v1875_v60 = vpack.c.bf16 %v2322_v57, %v2320_v53  ;;  %2333 = vtanh.f32 %v1389_v56  ;;  %v1381_v61 = vadd.f32 %v2808_v31, %v1380_v59 }
 0x35d   : > { %2335 = vtanh.f32 %v1378_v2  ;;  %v2216_v62 = vpop.f32.mrf.mxu1  ;;  %v2324_v55 = vpop.eup %2323 }
 0x35e   : > { %1876 = vst [vmem:[%s2823_s21] sm:$0xff] %v1875_v60   ;;  %2337 = vtanh.f32 %v1381_v61  ;;  %v1402_v63 = vadd.f32 %v2216_v62, %v2808_v31 }
 0x35f   : > { %v1393_v0 = vpop.f32.mrf.mxu1 }
 0x360   : > { %v1394_v3 = vadd.f32 %v2808_v31, %v1393_v0  ;;  %2339 = vtanh.f32 %v1402_v63 }
 0x361   : > { %v2326_v1 = vpop.eup %2325  ;;  %v2217_v4 = vpop.f32.mrf.mxu1 }
 0x362   : > { %v2328_v5 = vpop.eup %2327  ;;  %v1890_v6 = vpack.c.bf16 %v2326_v1, %v2324_v55  ;;  %v1405_v7 = vadd.f32 %v2217_v4, %v2808_v31 }
 0x363   : > { %v2330_v8 = vpop.eup %2329  ;;  %v1396_v9 = vpop.f32.mrf.mxu1 }
 0x364   : > { %1954 = vst [vmem:[%s2823_s21 + $0x18] sm:$0xff] %v1890_v6   ;;  %v1885_v10 = vpack.c.bf16 %v2330_v8, %v2328_v5  ;;  %2341 = vtanh.f32 %v1405_v7  ;;  %v1397_v11 = vadd.f32 %v2808_v31, %v1396_v9 }
 0x365   : > { %2343 = vtanh.f32 %v1394_v3  ;;  %v2220_v12 = vpop.f32.mrf.mxu1  ;;  %v2332_v15 = vpop.eup %2331 }
 0x366   : > { %1953 = vst [vmem:[%s2823_s21 + $0x10] sm:$0xff] %v1885_v10   ;;  %2345 = vtanh.f32 %v1397_v11  ;;  %v1418_v13 = vadd.f32 %v2220_v12, %v2808_v31 }
 0x367   : > { %v1409_v14 = vpop.f32.mrf.mxu1 }
 0x368   : > { %v1410_v17 = vadd.f32 %v2808_v31, %v1409_v14  ;;  %2347 = vtanh.f32 %v1418_v13 }
 0x369   : > { %v2334_v16 = vpop.eup %2333  ;;  %v2221_v18 = vpop.f32.mrf.mxu1 }
 0x36a   : > { %v2336_v19 = vpop.eup %2335  ;;  %v1900_v20 = vpack.c.bf16 %v2334_v16, %v2332_v15  ;;  %v1421_v21 = vadd.f32 %v2221_v18, %v2808_v31 }
 0x36b   : > { %v2338_v22 = vpop.eup %2337  ;;  %v1412_v23 = vpop.f32.mrf.mxu1 }
 0x36c   : > { %1956 = vst [vmem:[%s2823_s21 + $0x28] sm:$0xff] %v1900_v20   ;;  %v1895_v24 = vpack.c.bf16 %v2338_v22, %v2336_v19  ;;  %2349 = vtanh.f32 %v1421_v21  ;;  %v1413_v25 = vadd.f32 %v2808_v31, %v1412_v23 }
 0x36d   : > { %2351 = vtanh.f32 %v1410_v17  ;;  %v2224_v26 = vpop.f32.mrf.mxu1  ;;  %v2340_v29 = vpop.eup %2339 }
 0x36e   : > { %1955 = vst [vmem:[%s2823_s21 + $0x20] sm:$0xff] %v1895_v24   ;;  %2353 = vtanh.f32 %v1413_v25  ;;  %v1434_v27 = vadd.f32 %v2224_v26, %v2808_v31 }
 0x36f   : > { %v1425_v28 = vpop.f32.mrf.mxu1 }
 0x370   : > { %v1426_v32 = vadd.f32 %v2808_v31, %v1425_v28  ;;  %2355 = vtanh.f32 %v1434_v27 }
 0x371   : > { %v2342_v30 = vpop.eup %2341  ;;  %v2225_v33 = vpop.f32.mrf.mxu1 }
 0x372   : > { %v2344_v34 = vpop.eup %2343  ;;  %v1910_v46 = vpack.c.bf16 %v2342_v30, %v2340_v29  ;;  %v1437_v35 = vadd.f32 %v2225_v33, %v2808_v31 }
 0x373   : > { %v2346_v36 = vpop.eup %2345  ;;  %v1428_v37 = vpop.f32.mrf.mxu1 }
 0x374   : > { %1958 = vst [vmem:[%s2823_s21 + $0x38] sm:$0xff] %v1910_v46   ;;  %v1905_v38 = vpack.c.bf16 %v2346_v36, %v2344_v34  ;;  %2357 = vtanh.f32 %v1437_v35  ;;  %v1429_v39 = vadd.f32 %v2808_v31, %v1428_v37 }
 0x375   : > { %2359 = vtanh.f32 %v1426_v32  ;;  %v2228_v40 = vpop.f32.mrf.mxu1  ;;  %v2348_v43 = vpop.eup %2347 }
 0x376   : > { %1957 = vst [vmem:[%s2823_s21 + $0x30] sm:$0xff] %v1905_v38   ;;  %2361 = vtanh.f32 %v1429_v39  ;;  %v1450_v41 = vadd.f32 %v2228_v40, %v2808_v31 }
 0x377   : > { %v1441_v42 = vpop.f32.mrf.mxu1 }
 0x378   : > { %v1442_v44 = vadd.f32 %v2808_v31, %v1441_v42  ;;  %2363 = vtanh.f32 %v1450_v41 }
 0x379   : > { %v2350_v58 = vpop.eup %2349  ;;  %v2229_v45 = vpop.f32.mrf.mxu1 }
 0x37a   : > { %v2352_v47 = vpop.eup %2351  ;;  %v1920_v48 = vpack.c.bf16 %v2350_v58, %v2348_v43  ;;  %v1453_v49 = vadd.f32 %v2229_v45, %v2808_v31 }
 0x37b   : > { %v2354_v50 = vpop.eup %2353  ;;  %v1444_v51 = vpop.f32.mrf.mxu1 }
 0x37c   : > { %1960 = vst [vmem:[%s2823_s21 + $0x48] sm:$0xff] %v1920_v48   ;;  %v1915_v2 = vpack.c.bf16 %v2354_v50, %v2352_v47  ;;  %2365 = vtanh.f32 %v1453_v49  ;;  %v1445_v52 = vadd.f32 %v2808_v31, %v1444_v51 }
 0x37d   : > { %2367 = vtanh.f32 %v1442_v44  ;;  %v2232_v53 = vpop.f32.mrf.mxu1  ;;  %v2356_v57 = vpop.eup %2355 }
 0x37e   : > { %1959 = vst [vmem:[%s2823_s21 + $0x40] sm:$0xff] %v1915_v2   ;;  %2369 = vtanh.f32 %v1445_v52  ;;  %v1466_v54 = vadd.f32 %v2232_v53, %v2808_v31 }
 0x37f   : > { %v1457_v56 = vpop.f32.mrf.mxu1 }
 0x380   : > { %v1458_v60 = vadd.f32 %v2808_v31, %v1457_v56  ;;  %2371 = vtanh.f32 %v1466_v54 }
 0x381   : > { %v2358_v59 = vpop.eup %2357  ;;  %v2233_v61 = vpop.f32.mrf.mxu1 }
 0x382   : > { %v2360_v62 = vpop.eup %2359  ;;  %v1930_v63 = vpack.c.bf16 %v2358_v59, %v2356_v57  ;;  %v1469_v0 = vadd.f32 %v2233_v61, %v2808_v31 }
 0x383   : > { %v2362_v55 = vpop.eup %2361  ;;  %v1460_v1 = vpop.f32.mrf.mxu1 }
 0x384   : > { %1962 = vst [vmem:[%s2823_s21 + $0x58] sm:$0xff] %v1930_v63   ;;  %v1925_v3 = vpack.c.bf16 %v2362_v55, %v2360_v62  ;;  %2373 = vtanh.f32 %v1469_v0  ;;  %v1461_v4 = vadd.f32 %v2808_v31, %v1460_v1 }
 0x385   : > { %2375 = vtanh.f32 %v1458_v60  ;;  %v2364_v5 = vpop.eup %2363 }
 0x386   : > { %1961 = vst [vmem:[%s2823_s21 + $0x50] sm:$0xff] %v1925_v3   ;;  %2377 = vtanh.f32 %v1461_v4 }
 0x389   : > { %v2366_v6 = vpop.eup %2365 }
 0x38a   : > { %v2368_v7 = vpop.eup %2367  ;;  %v1940_v8 = vpack.c.bf16 %v2366_v6, %v2364_v5 }
 0x38b   : > { %v2370_v9 = vpop.eup %2369 }
 0x38c   : > { %1964 = vst [vmem:[%s2823_s21 + $0x68] sm:$0xff] %v1940_v8   ;;  %v1935_v10 = vpack.c.bf16 %v2370_v9, %v2368_v7 }
 0x38d   : > { %v2372_v11 = vpop.eup %2371 }
 0x38e   : > { %1963 = vst [vmem:[%s2823_s21 + $0x60] sm:$0xff] %v1935_v10  }
 0x391   : > { %v2374_v12 = vpop.eup %2373 }
 0x392   : > { %v2376_v13 = vpop.eup %2375  ;;  %v1950_v14 = vpack.c.bf16 %v2374_v12, %v2372_v11  ;;  %1671 = sbr.rel (!%p2532_p5) target bundleno = 946 (0x3b2), region = 60 }
 0x393   : > { %v2378_v15 = vpop.eup %2377 }
 0x394   : > { %1966 = vst [vmem:[%s2823_s21 + $0x78] sm:$0xff] %v1950_v14   ;;  %v1945_v31 = vpack.c.bf16 %v2378_v15, %v2376_v13 }
 0x396   : > { %1965 = vst [vmem:[%s2823_s21 + $0x70] sm:$0xff] %v1945_v31  }
 0x397   : > { %s2941_s17 = smov (!%p1674_p11, %s1673_s17), 32 }
 0x398   : > { %s2869_s24 = sshll.u32 %s2941_s17, 6 }
 0x399   : > { %s1678_s25 = ssub.s32 2048, %s2869_s24 }
 0x39a   : > { %1679 = vsyncadd %s2864_s22, %s1678_s25  ;;  %p1833_p12 = scmp.ne.s32.totalorder %s2869_s24, 0  ;;  %s1871_s26 = sshll.u32 %s2515_s13, 11 }
 0x39b   : > { %s2878_s28 = scalar_lea.hbm %s2933_s9, %s1871_s26  ;;  %s1684_s23 = sshll.u32 %s2823_s21, 4  ;;  %s2881_s23 = int_to_ptr.vmem [resolvable:$true] %s1684_s23 }
 0x39c   : > { %s2379_s29 = scalar_lea.vmem %s2881_s23, %s2869_s24  ;;  %s2441_s14 = smov [#allocation2]  }
 0x39d   : > { %p2380_p13 = scmp.ne.s32.totalorder %s2881_s23, %s2379_s29  ;;  %s2383_s16 = sshll.u32 %s2441_s14, 4  ;;  %s2384_s16 = int_to_ptr.vmem [resolvable:$false] %s2383_s16 }
 0x39e   : > { %s2385_s13 = scalar_lea.vmem %s2384_s16, 4096  ;;  %p2386_p2 = scmp.lt.s32.totalorder %s2881_s23, %s2384_s16 }
 0x39f   : > { %p2381_p0 = pnand %p2380_p13, %p1833_p12  ;;  %p2387_p3 = scmp.lt.s32.totalorder %s2385_s13, %s2379_s29 }
 0x3a1   : > { %p2382_p1 = pneg %p2381_p0  ;;  %p2388_p4 = por %p2387_p3, %p2386_p2 }
 0x3a3   : > { %p2389_p5 = pnand %p2388_p4, %p2382_p1 }
 0x3a5   : > { %2392 = shalt.err (!%p2389_p5)
}
 0x3a6   : > { %s2393_s21 = scalar_lea.hbm %s2878_s28, %s2869_s24  ;;  %s2397_s26 = scalar_lea.hbm %s2933_s9, 4032 }
 0x3a7   : > { %p2394_p7 = scmp.ne.s32.totalorder %s2878_s28, %s2393_s21  ;;  %p2398_p10 = scmp.lt.s32.totalorder %s2878_s28, %s2933_s9 }
 0x3a8   : > { %p2399_p11 = scmp.lt.s32.totalorder %s2397_s26, %s2393_s21 }
 0x3a9   : > { %p2395_p8 = pnand %p2394_p7, %p1833_p12 }
 0x3aa   : > { %p2400_p13 = por %p2399_p11, %p2398_p10 }
 0x3ab   : > { %p2396_p9 = pneg %p2395_p8 }
 0x3ad   : > { %p2401_p0 = pnand %p2400_p13, %p2396_p9 }
 0x3af   : > { %2404 = shalt.err (!%p2401_p0)
}
 0x3b0   : > { %s2442_s29 = smov 64   ;;  %s2443_s14 = smov 4  }
 0x3b1   : > { %1690 = dma.vmem_to_hbm [thread:$0]  (%p1833_p12), %s2881_s23, %s2869_s24, %s2878_s28, %s2864_s22, %s2442_s29, %s2442_s29, %s2443_s14  }
 0x3b2 PF: > { %p2255_p1 = scmp.ge.s32.totalorder %s2439_s12, 2  ;;  %s1699_s16 = sand.u32 1, %s2427_s30  }
 0x3b3   : > { %s1700_s13 = scalar_lea.sflag [#allocation3], %s1699_s16 }
 0x3b4   : > { %p2252_p2 = pnand %p2255_p1, %p2536_p6 }
 0x3b6   : > { %p2253_p3 = pneg %p2252_p2 }
 0x3b8   : > { %2422 = dma.done.wait (%p2253_p3), %s1700_s13, 2048  }
 0x3b9   : > { %2424 = vsyncadd (%p2253_p3), %s1700_s13, 4294965248  ;;  %p19_p4 = scmp.ge.s32.totalorder %s2519_s15, 4   ;;  %s2936_s30 = smov %s2431_s10 }
 0x3ba   : > { %s2937_s10 = smov %s2435_s11  ;;  %s2938_s11 = smov %s2530_s18 }
 0x3bb   : > { %s2939_s12 = smov %s2519_s15  ;;  %21 = sbr.rel (!%p19_p4) target bundleno = 3 (0x3), region = 91 }
 0x3c0   :  { %1705 = vsyncpa [#allocation3], 1 }
 0x3c1   :  { %1707 = vsyncpa [#allocation3 + $0x1], 1 }

</bundles_post_ra>
